<compile_context>
chip_gen: v6e
topology: v6e:2x2x1
jax: 0.10.0
libtpu: 0.0.40
codegen_flags: <defaults>
</compile_context>

<pallas_src>
import functools

import jax
import jax.numpy as jnp
from jax import lax
from jax.experimental import pallas as pl
from jax.experimental.pallas import tpu as pltpu


# ----------------------------- fused Pallas kernel -----------------------------

def _fused_kernel(seed_ref, valid_ref, ids_ref, seg_ref,
                  tok_emb_ref, type_emb_ref, w_pool_ref, b_pool_ref,
                  w_cls_ref, b_cls_ref, out_ref, *, dr_rate, training):
    B, S = ids_ref.shape
    V, H = tok_emb_ref.shape
    T = type_emb_ref.shape[0]
    BS = B * S

    ids = ids_ref[...]                                    # (B, S) i32
    segs = seg_ref[...]                                   # (B, S) i32
    valid = valid_ref[...]                                # (B, 1) i32 (pre-clamped to <= S)

    # --- BERT stand-in: embedding lookup as one-hot matmuls on the MXU ---------
    # TODO(synk): full BERT encoder (self-attention stack) is injected externally
    # in the original module and is not reproduced; only the pooler-shaped output
    # is synthesized deterministically.
    v_iota = lax.broadcasted_iota(jnp.int32, (B, S, V), 2)
    tok_oh = (v_iota == ids[:, :, None]).astype(jnp.bfloat16).reshape(BS, V)
    t_iota = lax.broadcasted_iota(jnp.int32, (B, S, T), 2)
    seg_oh = (t_iota == segs[:, :, None]).astype(jnp.bfloat16).reshape(BS, T)

    emb = (jnp.dot(tok_oh, tok_emb_ref[...], preferred_element_type=jnp.float32)
           + jnp.dot(seg_oh, type_emb_ref[...], preferred_element_type=jnp.float32))  # (BS, H) f32

    # --- gen_attention_mask + masked mean, as a single MXU contraction ----------
    # mask_flat[b, b*S + s] = 1.0 iff s < valid_length[b]; pooled = mask_flat @ emb
    row = lax.broadcasted_iota(jnp.int32, (B, BS), 0)
    col = lax.broadcasted_iota(jnp.int32, (B, BS), 1)
    s_idx = col - row * S
    in_row = jnp.logical_and(s_idx >= 0, s_idx < S)
    mask_flat = jnp.logical_and(in_row, s_idx < valid).astype(jnp.bfloat16)   # (B, BS)

    msum = jnp.maximum(valid, 1).astype(jnp.float32)                          # (B, 1)
    pooled = jnp.dot(mask_flat, emb.astype(jnp.bfloat16),
                     preferred_element_type=jnp.float32) / msum               # (B, H) f32

    # --- pooler dense + tanh -----------------------------------------------------
    h = jnp.dot(pooled.astype(jnp.bfloat16), w_pool_ref[...],
                preferred_element_type=jnp.float32) + b_pool_ref[...]
    x = jnp.tanh(h)                                                           # (B, H) f32

    # --- nn.Dropout(p=dr_rate) (training mode only) ------------------------------
    if training and dr_rate:
        pltpu.prng_seed(seed_ref[0])
        bits = pltpu.bitcast(pltpu.prng_random_bits(x.shape), jnp.uint32)
        r = (bits >> jnp.uint32(1)).astype(jnp.int32)          # uniform in [0, 2^31)
        thresh = jnp.int32(int(dr_rate * float(1 << 31)))
        x = jnp.where(r >= thresh, x * (1.0 / (1.0 - dr_rate)), 0.0)
    # else: eval-mode dropout is the identity (server inference path).

    # --- classifier head into a lane-dense padded logits slab --------------------
    out_ref[...] = jnp.dot(x.astype(jnp.bfloat16), w_cls_ref[...],
                           preferred_element_type=jnp.float32) + b_cls_ref[...]


# ------------------------------- wrappers ----------------------------------

_VMEM = pl.BlockSpec(memory_space=pltpu.MemorySpace.VMEM)
_SMEM = pl.BlockSpec(memory_space=pltpu.MemorySpace.SMEM)


def bert_classifier_forward(prepared, token_ids, valid_length, segment_ids,
                            dr_rate=None, training=False, seed=0):
    B, S = token_ids.shape
    CP = prepared["w_cls_t_pad"].shape[1]
    C = prepared["num_classes"]

    valid = jnp.minimum(valid_length.astype(jnp.int32), S).reshape(B, 1)
    kernel = functools.partial(_fused_kernel, dr_rate=dr_rate, training=training)

    logits_pad = pl.pallas_call(
        kernel,
        out_shape=jax.ShapeDtypeStruct((B, CP), jnp.float32),
        in_specs=[_SMEM, _VMEM, _VMEM, _VMEM, _VMEM,
                  _VMEM, _VMEM, _VMEM, _VMEM, _VMEM],
        out_specs=_VMEM,
    )(jnp.asarray([seed], dtype=jnp.int32), valid,
      token_ids.astype(jnp.int32), segment_ids.astype(jnp.int32),
      prepared["tok_emb"], prepared["type_emb"],
      prepared["w_pool"], prepared["b_pool"],
      prepared["w_cls_t_pad"], prepared["b_cls_pad"])

    return logits_pad[:, :C]


def init_params(key, vocab, n_types, hidden, num_classes):
    k = jax.random.split(key, 6)
    s = 0.02
    return {
        "tok_emb": s * jax.random.normal(k[0], (vocab, hidden), jnp.float32),
        "type_emb": s * jax.random.normal(k[1], (n_types, hidden), jnp.float32),
        "w_pool": s * jax.random.normal(k[2], (hidden, hidden), jnp.float32),
        "b_pool": jnp.zeros((hidden,), jnp.float32),
        # nn.Linear(hidden, num_classes).weight has shape (C, H); store transposed.
        "w_cls_t": s * jax.random.normal(k[3], (hidden, num_classes), jnp.float32),
        "b_cls": s * jax.random.normal(k[4], (num_classes,), jnp.float32),
    }


def prepare_params(params, num_classes, lane=128):
    """One-time conversion to the kernel-ready layout: bf16 matmul operands,
    lane-padded classifier (C -> multiple of 128), sublane-padded type table."""
    H = params["w_pool"].shape[0]
    C = num_classes
    CP = ((C + lane - 1) // lane) * lane
    T = params["type_emb"].shape[0]
    TP = ((T + 7) // 8) * 8

    w_cls_pad = jnp.zeros((H, CP), jnp.bfloat16).at[:, :C].set(
        params["w_cls_t"].astype(jnp.bfloat16))
    b_cls_pad = jnp.zeros((1, CP), jnp.float32).at[0, :C].set(params["b_cls"])
    type_emb_pad = jnp.zeros((TP, H), jnp.bfloat16).at[:T].set(
        params["type_emb"].astype(jnp.bfloat16))

    return {
        "tok_emb": params["tok_emb"].astype(jnp.bfloat16),
        "type_emb": type_emb_pad,
        "w_pool": params["w_pool"].astype(jnp.bfloat16),
        "b_pool": params["b_pool"].reshape(1, H).astype(jnp.float32),
        "w_cls_t_pad": w_cls_pad,
        "b_cls_pad": b_cls_pad,
        "num_classes": C,
    }


if __name__ == "__main__":
    B, S, H, C, V = 4, 16, 128, 7, 128   # small shapes; hidden_size=128, num_classes=7

    key = jax.random.PRNGKey(0)
    k1, k2, k3 = jax.random.split(key, 3)
    token_ids = jax.random.randint(k1, (B, S), 0, V, dtype=jnp.int32)
    valid_length = jax.random.randint(k2, (B,), 1, S + 1, dtype=jnp.int32)
    segment_ids = jax.random.randint(k3, (B, S), 0, 2, dtype=jnp.int32)

    params = init_params(jax.random.PRNGKey(42), V, 2, H, C)
    prepared = prepare_params(params, num_classes=C)

    # dr_rate must be set (otherwise the original forward hits an undefined `out`);
    # server inference runs in eval mode, so dropout is the identity.
    logits = bert_classifier_forward(prepared, token_ids, valid_length, segment_ids,
                                     dr_rate=0.1, training=False, seed=0)
    jax.block_until_ready(logits)
    assert logits.shape == (B, C) and logits.dtype == jnp.float32
    assert bool(jnp.all(jnp.isfinite(logits)))
    print("KERNEL_OK")
</pallas_src>

<mosaic_0001>
module attributes {stable_mosaic.version = 11 : i64} {
  func.func @_fused_kernel(%arg0: memref<1xi32, #tpu.memory_space<smem>>, %arg1: memref<4x1xi32, #tpu.memory_space<vmem>>, %arg2: memref<4x16xi32, #tpu.memory_space<vmem>>, %arg3: memref<4x16xi32, #tpu.memory_space<vmem>>, %arg4: memref<128x128xbf16, #tpu.memory_space<vmem>>, %arg5: memref<8x128xbf16, #tpu.memory_space<vmem>>, %arg6: memref<128x128xbf16, #tpu.memory_space<vmem>>, %arg7: memref<1x128xf32, #tpu.memory_space<vmem>>, %arg8: memref<128x128xbf16, #tpu.memory_space<vmem>>, %arg9: memref<1x128xf32, #tpu.memory_space<vmem>>, %arg10: memref<4x128xf32, #tpu.memory_space<vmem>>) attributes {dimension_semantics = [], scalar_prefetch = 0 : i64, scratch_operands = 0 : i64, tpu.core_type = #tpu.core_type<tc>} {
    %c0 = arith.constant 0 : index
    %c0_0 = arith.constant 0 : index
    %0 = vector.load %arg2[%c0, %c0_0] : memref<4x16xi32, #tpu.memory_space<vmem>>, vector<4x16xi32>
    %c0_1 = arith.constant 0 : index
    %c0_2 = arith.constant 0 : index
    %1 = vector.load %arg3[%c0_1, %c0_2] : memref<4x16xi32, #tpu.memory_space<vmem>>, vector<4x16xi32>
    %c0_3 = arith.constant 0 : index
    %c0_4 = arith.constant 0 : index
    %2 = vector.load %arg1[%c0_3, %c0_4] : memref<4x1xi32, #tpu.memory_space<vmem>>, vector<4x1xi32>
    %3 = tpu.iota {dimensions = array<i32: 2>} : vector<4x16x128xi32>
    %4 = vector.shape_cast %0 : vector<4x16xi32> to vector<4x16x1xi32>
    %5 = vector.broadcast %4 : vector<4x16x1xi32> to vector<4x16x128xi32>
    %6 = arith.cmpi eq, %3, %5 : vector<4x16x128xi32>
    %7 = arith.extui %6 : vector<4x16x128xi1> to vector<4x16x128xi32>
    %8 = arith.sitofp %7 : vector<4x16x128xi32> to vector<4x16x128xf32>
    %9 = arith.truncf %8 : vector<4x16x128xf32> to vector<4x16x128xbf16>
    %10 = vector.shape_cast %9 : vector<4x16x128xbf16> to vector<64x128xbf16>
    %11 = tpu.iota {dimensions = array<i32: 2>} : vector<4x16x8xi32>
    %12 = vector.shape_cast %1 : vector<4x16xi32> to vector<4x16x1xi32>
    %13 = vector.broadcast %12 : vector<4x16x1xi32> to vector<4x16x8xi32>
    %14 = arith.cmpi eq, %11, %13 : vector<4x16x8xi32>
    %15 = arith.extui %14 : vector<4x16x8xi1> to vector<4x16x8xi32>
    %16 = arith.sitofp %15 : vector<4x16x8xi32> to vector<4x16x8xf32>
    %17 = arith.truncf %16 : vector<4x16x8xf32> to vector<4x16x8xbf16>
    %18 = vector.shape_cast %17 : vector<4x16x8xbf16> to vector<64x8xbf16>
    %c0_5 = arith.constant 0 : index
    %c0_6 = arith.constant 0 : index
    %19 = vector.load %arg4[%c0_5, %c0_6] : memref<128x128xbf16, #tpu.memory_space<vmem>>, vector<128x128xbf16>
    %cst = arith.constant dense<0.000000e+00> : vector<64x128xf32>
    %20 = tpu.matmul %10, %19, %cst {dimension_numbers = #tpu.dot_dimension_numbers<[1], [0], [0], [1], [0, 0, 1, 1], [], []>} : vector<64x128xbf16>, vector<128x128xbf16>, vector<64x128xf32> -> vector<64x128xf32>
    %c0_7 = arith.constant 0 : index
    %c0_8 = arith.constant 0 : index
    %21 = vector.load %arg5[%c0_7, %c0_8] : memref<8x128xbf16, #tpu.memory_space<vmem>>, vector<8x128xbf16>
    %cst_9 = arith.constant dense<0.000000e+00> : vector<64x128xf32>
    %22 = tpu.matmul %18, %21, %cst_9 {dimension_numbers = #tpu.dot_dimension_numbers<[1], [0], [0], [1], [0, 0, 1, 1], [], []>} : vector<64x8xbf16>, vector<8x128xbf16>, vector<64x128xf32> -> vector<64x128xf32>
    %23 = arith.addf %20, %22 : vector<64x128xf32>
    %24 = tpu.iota {dimensions = array<i32: 0>} : vector<4x64xi32>
    %25 = tpu.iota {dimensions = array<i32: 1>} : vector<4x64xi32>
    %c16_i32 = arith.constant 16 : i32
    %26 = vector.broadcast %c16_i32 : i32 to vector<4x64xi32>
    %27 = arith.muli %24, %26 : vector<4x64xi32>
    %28 = arith.subi %25, %27 : vector<4x64xi32>
    %c0_i32 = arith.constant 0 : i32
    %29 = vector.broadcast %c0_i32 : i32 to vector<4x64xi32>
    %30 = arith.cmpi sge, %28, %29 : vector<4x64xi32>
    %c16_i32_10 = arith.constant 16 : i32
    %31 = vector.broadcast %c16_i32_10 : i32 to vector<4x64xi32>
    %32 = arith.cmpi slt, %28, %31 : vector<4x64xi32>
    %33 = arith.andi %30, %32 : vector<4x64xi1>
    %34 = vector.broadcast %2 : vector<4x1xi32> to vector<4x64xi32>
    %35 = arith.cmpi slt, %28, %34 : vector<4x64xi32>
    %36 = arith.andi %33, %35 : vector<4x64xi1>
    %37 = arith.extui %36 : vector<4x64xi1> to vector<4x64xi32>
    %38 = arith.sitofp %37 : vector<4x64xi32> to vector<4x64xf32>
    %39 = arith.truncf %38 : vector<4x64xf32> to vector<4x64xbf16>
    %c1_i32 = arith.constant 1 : i32
    %40 = vector.broadcast %c1_i32 : i32 to vector<4x1xi32>
    %41 = arith.maxsi %2, %40 : vector<4x1xi32>
    %42 = arith.sitofp %41 : vector<4x1xi32> to vector<4x1xf32>
    %43 = arith.truncf %23 : vector<64x128xf32> to vector<64x128xbf16>
    %cst_11 = arith.constant dense<0.000000e+00> : vector<4x128xf32>
    %44 = tpu.matmul %39, %43, %cst_11 {dimension_numbers = #tpu.dot_dimension_numbers<[1], [0], [0], [1], [0, 0, 1, 1], [], []>} : vector<4x64xbf16>, vector<64x128xbf16>, vector<4x128xf32> -> vector<4x128xf32>
    %45 = vector.broadcast %42 : vector<4x1xf32> to vector<4x128xf32>
    %46 = arith.divf %44, %45 : vector<4x128xf32>
    %47 = arith.truncf %46 : vector<4x128xf32> to vector<4x128xbf16>
    %c0_12 = arith.constant 0 : index
    %c0_13 = arith.constant 0 : index
    %48 = vector.load %arg6[%c0_12, %c0_13] : memref<128x128xbf16, #tpu.memory_space<vmem>>, vector<128x128xbf16>
    %cst_14 = arith.constant dense<0.000000e+00> : vector<4x128xf32>
    %49 = tpu.matmul %47, %48, %cst_14 {dimension_numbers = #tpu.dot_dimension_numbers<[1], [0], [0], [1], [0, 0, 1, 1], [], []>} : vector<4x128xbf16>, vector<128x128xbf16>, vector<4x128xf32> -> vector<4x128xf32>
    %c0_15 = arith.constant 0 : index
    %c0_16 = arith.constant 0 : index
    %50 = vector.load %arg7[%c0_15, %c0_16] : memref<1x128xf32, #tpu.memory_space<vmem>>, vector<1x128xf32>
    %51 = vector.broadcast %50 : vector<1x128xf32> to vector<4x128xf32>
    %52 = arith.addf %49, %51 : vector<4x128xf32>
    %53 = math.tanh %52 : vector<4x128xf32>
    %54 = arith.truncf %53 : vector<4x128xf32> to vector<4x128xbf16>
    %c0_17 = arith.constant 0 : index
    %c0_18 = arith.constant 0 : index
    %55 = vector.load %arg8[%c0_17, %c0_18] : memref<128x128xbf16, #tpu.memory_space<vmem>>, vector<128x128xbf16>
    %cst_19 = arith.constant dense<0.000000e+00> : vector<4x128xf32>
    %56 = tpu.matmul %54, %55, %cst_19 {dimension_numbers = #tpu.dot_dimension_numbers<[1], [0], [0], [1], [0, 0, 1, 1], [], []>} : vector<4x128xbf16>, vector<128x128xbf16>, vector<4x128xf32> -> vector<4x128xf32>
    %c0_20 = arith.constant 0 : index
    %c0_21 = arith.constant 0 : index
    %57 = vector.load %arg9[%c0_20, %c0_21] : memref<1x128xf32, #tpu.memory_space<vmem>>, vector<1x128xf32>
    %58 = vector.broadcast %57 : vector<1x128xf32> to vector<4x128xf32>
    %59 = arith.addf %56, %58 : vector<4x128xf32>
    %c0_22 = arith.constant 0 : index
    %c0_23 = arith.constant 0 : index
    %60 = vector.load %arg10[%c0_22, %c0_23] : memref<4x128xf32, #tpu.memory_space<vmem>>, vector<4x128xf32>
    tpu.vector_store %arg10[%c0_22, %c0_23], %59 {strides = array<i32>} : memref<4x128xf32, #tpu.memory_space<vmem>>, vector<4x128xf32>,
    return
  }
}

</mosaic_0001>

<bundles_post_ra>
// kernel: tpu_custom_call.1
= control target key start
LH: loop header
LB: loop body
LE: loop exit
PB: predicated region body
PF: predicated region fallthrough
CT: control target
= control target key end

     0   :  { %16 = vsyncpa [#allocation4], 0  ;;  %s1231_s0 = inlined_call_operand.<no memory space> [shape: s32[1], index: 0, kind: input, shape index: {}]   ;;  %s1232_s1 = inlined_call_operand.vmem [shape: s32[4,1], index: 1, kind: input, shape index: {}]   ;;  %s1233_s2 = inlined_call_operand.vmem [shape: s32[4,16], index: 2, kind: input, shape index: {}]   ;;  %s1234_s3 = inlined_call_operand.vmem [shape: s32[4,16], index: 3, kind: input, shape index: {}]   ;;  %s1235_s4 = inlined_call_operand.hbm [shape: bf16[128,128], index: 4, kind: input, shape index: {}]   ;;  %s1236_s5 = inlined_call_operand.vmem [shape: bf16[8,128], index: 5, kind: input, shape index: {}]   ;;  %s1237_s6 = inlined_call_operand.hbm [shape: bf16[128,128], index: 6, kind: input, shape index: {}]   ;;  %s1238_s7 = inlined_call_operand.vmem [shape: f32[1,128], index: 7, kind: input, shape index: {}]   ;;  %s1239_s8 = inlined_call_operand.hbm [shape: bf16[128,128], index: 8, kind: input, shape index: {}]   ;;  %s1240_s9 = inlined_call_operand.vmem [shape: f32[1,128], index: 9, kind: input, shape index: {}]   ;;  %s1241_s10 = inlined_call_operand.hbm [shape: f32[4,128], index: 10, kind: output, shape index: {}]  }
   0x1   :  { %17 = vsyncpa [#allocation7], 0 }
   0x2   :  { %18 = vsyncpa [#allocation5], 0  ;;  %s1064_s12 = smov [#allocation6]   ;;  %s1065_s14 = smov [#allocation3]  }
   0x3   :  { %s46_s13 = sshll.u32 %s1064_s12, 4  ;;  %s32_s15 = sshll.u32 %s1065_s14, 4  ;;  %s47_s13 = int_to_ptr.vmem [resolvable:$true] %s46_s13  ;;  %s33_s15 = int_to_ptr.vmem [resolvable:$true] %s32_s15 }
   0x4   :  { %s986_s16 = scalar_lea.vmem %s47_s13, 1024  ;;  %p991_p1 = scmp.lt.s32.totalorder %s47_s13, %s47_s13 }
   0x5   :  { %p987_p0 = scmp.ne.s32.totalorder %s47_s13, %s986_s16  ;;  %p992_p2 = scmp.lt.s32.totalorder %s986_s16, %s986_s16 }
   0x7   :  { %p993_p3 = por %p992_p2, %p991_p1 }
   0x9   :  { %p994_p4 = pnand %p993_p3, %p987_p0 }
   0xb   :  { %997 = shalt.err (!%p994_p4)
}
   0xc   :  { %s1066_s17 = smov 64   ;;  %s1067_s18 = smov 4  }
   0xd   :  { %52 = dma.hbm_to_vmem [thread:$0]  %s1237_s6, 1024, %s47_s13, [#allocation7], %s1066_s17, %s1066_s17, %s1067_s18  }
   0xe   :  { %s1006_s21 = scalar_lea.vmem %s33_s15, 1024  ;;  %p1011_p6 = scmp.lt.s32.totalorder %s33_s15, %s33_s15 }
   0xf   :  { %p1007_p5 = scmp.ne.s32.totalorder %s33_s15, %s1006_s21  ;;  %p1012_p7 = scmp.lt.s32.totalorder %s1006_s21, %s1006_s21 }
  0x11   :  { %p1013_p8 = por %p1012_p7, %p1011_p6 }
  0x13   :  { %p1014_p9 = pnand %p1013_p8, %p1007_p5 }
  0x15   :  { %1017 = shalt.err (!%p1014_p9)
}
  0x16   :  { %38 = dma.hbm_to_vmem [thread:$0]  %s1235_s4, 1024, %s33_s15, [#allocation4], %s1066_s17, %s1066_s17, %s1067_s18  }
  0x17   :  { %s1068_s24 = smov [#allocation8]  }
  0x18   :  { %s60_s25 = sshll.u32 %s1068_s24, 4  ;;  %s61_s25 = int_to_ptr.vmem [resolvable:$true] %s60_s25 }
  0x19   :  { %s1026_s0 = scalar_lea.vmem %s61_s25, 1024  ;;  %p1031_p11 = scmp.lt.s32.totalorder %s61_s25, %s61_s25 }
  0x1a   :  { %p1027_p10 = scmp.ne.s32.totalorder %s61_s25, %s1026_s0  ;;  %p1032_p12 = scmp.lt.s32.totalorder %s1026_s0, %s1026_s0 }
  0x1c   :  { %p1033_p13 = por %p1032_p12, %p1031_p11 }
  0x1e   :  { %p1034_p0 = pnand %p1033_p13, %p1027_p10 }
  0x20   :  { %1037 = shalt.err (!%p1034_p0)
}
  0x21   :  { %66 = dma.hbm_to_vmem [thread:$0]  %s1239_s8, 1024, %s61_s25, [#allocation7], %s1066_s17, %s1066_s17, %s1067_s18  }
  0x22   :  { %1058 = dma.done.wait [#allocation4], 1024  }
  0x23   :  { %1059 = vsyncadd [#allocation4], 4294966272 }
  0x24   :  { %1060 = dma.done.wait [#allocation7], 2048  }
  0x25   :  { %1061 = vsyncadd [#allocation7], 4294965248  ;;  %v82_v0 = vlaneseq  ;;  %v80_v4 = vld [vmem:[%s1234_s3] sm:$0xf]  ;;  %v950_v7 = vld [vmem:[#allocation3 + $0x38] sm:$0xff]   ;;  %vm258_vm0 = vcmask 1043456  }
  0x26   :  { %v951_v8 = vld [vmem:[#allocation3 + $0x30] sm:$0xff]   ;;  %v79_v9 = vld [vmem:[%s1233_s2] sm:$0xf]  ;;  %861 = vmatprep.subr.bf16.mxu1 %v950_v7  ;;  %v952_v10 = vld [vmem:[#allocation3 + $0x28] sm:$0xff]   ;;  %v1069_v17 = vmov 0.0   ;;  %v1070_v23 = vmov 0  }
  0x27   :  { %v1139_v1 = vshrl.u32 %v82_v0, 7  ;;  %862 = vmatpush3.bf16.msra.mxu1 %v950_v7  ;;  %v244_v11 = vld [vmem:[%s1236_s5] sm:$0xf]  ;;  %v954_v19 = vld [vmem:[#allocation3 + $0x18] sm:$0xff]   ;;  %v955_v21 = vld [vmem:[#allocation3 + $0x10] sm:$0xff]   ;;  %948 = vset.pattern.permute.xlu0 %v1070_v23  ;;  %v1163_v29 = vand.u32 127, %v82_v0 }
  0x28   :  { %863 = vmatprep.subr.bf16.mxu1 %v951_v8  ;;  %v260_v14 = vsel %vm258_vm0, %v244_v11, 0  ;;  %937 = vmatprep.subr.msk.bf16.mxu0 %vm258_vm0, %v244_v11  ;;  %v953_v16 = vld [vmem:[#allocation3 + $0x20] sm:$0xff]   ;;  %v956_v24 = vld [vmem:[#allocation3 + $0x8] sm:$0xff]   ;;  %vm245_vm5 = vcmask 64512   ;;  %v1071_v42 = vmov 1.0|1.0  }
  0x29   :  { %v97_v2 = vsub.s32 1, %v1139_v1  ;;  %v86_v3 = vsub.s32 0, %v1139_v1  ;;  %v108_v13 = vsub.s32 2, %v1139_v1  ;;  %v119_v15 = vsub.s32 3, %v1139_v1  ;;  %852 = vmatpush3.bf16.msra.mxu0 %v260_v14  ;;  %949 = vset.pattern.permute.xlu1 %v1070_v23  ;;  %v957_v26 = vld [vmem:[#allocation3] sm:$0xff]   ;;  %s1073_s13 = smov [#allocation9]  }
  0x2a   :  { %885 = vmatprep.subr.bf16.mxu0 %v1069_v17  ;;  %v1158_v28 = vld [vmem:[%s1232_s1] sm:$0xf]  ;;  %s745_s14 = sshll.u32 %s1073_s13, 4  ;;  %s746_s14 = int_to_ptr.vmem [resolvable:$true] %s745_s14 }
  0x2b   :  { %v170_v5 = vrot.slane %v80_v4, %v97_v2  ;;  %v159_v6 = vrot.slane %v80_v4, %v86_v3  ;;  %v87_v12 = vrot.slane %v79_v9, %v86_v3  ;;  %864 = vmatpush3.bf16.msra.mxu1 %v951_v8  ;;  %v98_v18 = vrot.slane %v79_v9, %v97_v2  ;;  %p1043_p2 = scmp.lt.s32.totalorder %s746_s14, %s746_s14 }
  0x2c   :  { %865 = vmatprep.subr.bf16.mxu1 %v952_v10  ;;  %v181_v20 = vrot.slane %v80_v4, %v108_v13  ;;  %v192_v22 = vrot.slane %v80_v4, %v119_v15  ;;  %v109_v25 = vrot.slane %v79_v9, %v108_v13  ;;  %v120_v27 = vrot.slane %v79_v9, %v119_v15 }
  0x2d   :  { %172 = vbcast.lane.b32.xlu1 %v170_v5, 256  ;;  %161 = vbcast.lane.b32.xlu0 %v159_v6, 256  ;;  %v442_v9 = vmul.u32 16, %v1139_v1 }
  0x2f   :  { %866 = vmatpush3.bf16.msra.mxu1 %v952_v10  ;;  %v443_v13 = vsub.s32 %v1163_v29, %v442_v9 }
  0x30   :  { %867 = vmatprep.subr.bf16.mxu1 %v953_v16 }
  0x31   :  { %176 = vbcast.lane.b32.xlu1 %v170_v5, 264  ;;  %165 = vbcast.lane.b32.xlu0 %v159_v6, 264 }
  0x33   :  { %868 = vmatpush3.bf16.msra.mxu1 %v953_v16 }
  0x34   :  { %869 = vmatprep.subr.bf16.mxu1 %v954_v19 }
  0x35   :  { %93 = vbcast.lane.b32.xlu1 %v87_v12, 264  ;;  %89 = vbcast.lane.b32.xlu0 %v87_v12, 256 }
  0x37   :  { %870 = vmatpush3.bf16.msra.mxu1 %v954_v19 }
  0x38   :  { %871 = vmatprep.subr.bf16.mxu1 %v955_v21 }
  0x39   :  { %104 = vbcast.lane.b32.xlu1 %v98_v18, 264  ;;  %100 = vbcast.lane.b32.xlu0 %v98_v18, 256 }
  0x3b   :  { %872 = vmatpush3.bf16.msra.mxu1 %v955_v21 }
  0x3c   :  { %873 = vmatprep.subr.bf16.mxu1 %v956_v24 }
  0x3d   :  { %187 = vbcast.lane.b32.xlu1 %v181_v20, 264  ;;  %183 = vbcast.lane.b32.xlu0 %v181_v20, 256 }
  0x3f   :  { %874 = vmatpush3.bf16.msra.mxu1 %v956_v24 }
  0x40   :  { %875 = vmatprep.subr.bf16.mxu1 %v957_v26 }
  0x41   :  { %198 = vbcast.lane.b32.xlu1 %v192_v22, 264  ;;  %194 = vbcast.lane.b32.xlu0 %v192_v22, 256 }
  0x43   :  { %876 = vmatpush3.bf16.msra.mxu1 %v957_v26 }
  0x44   :  { %917 = vmatprep.subr.bf16.mxu1 %v1069_v17 }
  0x45   :  { %115 = vbcast.lane.b32.xlu1 %v109_v25, 264  ;;  %111 = vbcast.lane.b32.xlu0 %v109_v25, 256 }
  0x49   :  { %126 = vbcast.lane.b32.xlu1 %v120_v27, 264  ;;  %122 = vbcast.lane.b32.xlu0 %v120_v27, 256 }
  0x4d   :  { %448 = vperm.xlu0 %948, %v1158_v28  }
  0x9f   :  { %v173_v30 = vpop.permute.xlu1 %172  ;;  %v162_v31 = vpop.permute.xlu0 %161 }
  0xa0   :  { %vm202_vm1 = vcmp.eq.s32.totalorder %v1163_v29, %v173_v30  ;;  %vm200_vm2 = vcmp.eq.s32.totalorder %v1163_v29, %v162_v31  ;;  %v958_v31 = vld [vmem:[#allocation6 + $0x38] sm:$0xff]  }
  0xa1   :  { %v765_v34 = vsel %vm202_vm1, 1.0, %v1069_v17  ;;  %v763_v35 = vsel %vm200_vm2, 1.0, %v1069_v17 }
  0xa3   :  { %v177_v32 = vpop.permute.xlu1 %176  ;;  %v166_v33 = vpop.permute.xlu0 %165 }
  0xa4   :  { %vm203_vm3 = vcmp.eq.s32.totalorder %v1163_v29, %v177_v32  ;;  %vm201_vm4 = vcmp.eq.s32.totalorder %v1163_v29, %v166_v33  ;;  %v959_v32 = vld [vmem:[#allocation6 + $0x30] sm:$0xff]   ;;  %v960_v33 = vld [vmem:[#allocation6 + $0x28] sm:$0xff]  }
  0xa5   :  { %v766_v36 = vsel %vm203_vm3, 1.0, %v1069_v17  ;;  %v764_v37 = vsel %vm201_vm4, 1.0, %v1069_v17 }
  0xa6   :  { %v225_v38 = vpack.c.bf16 %v766_v36, %v765_v34  ;;  %v224_v39 = vpack.c.bf16 %v764_v37, %v763_v35  ;;  %v961_v34 = vld [vmem:[#allocation6 + $0x20] sm:$0xff]   ;;  %v962_v35 = vld [vmem:[#allocation6 + $0x18] sm:$0xff]   ;;  %v963_v36 = vld [vmem:[#allocation6 + $0x10] sm:$0xff]  }
  0xa7   :  { %v94_v40 = vpop.permute.xlu1 %93  ;;  %v90_v41 = vpop.permute.xlu0 %89  ;;  %v964_v37 = vld [vmem:[#allocation6 + $0x8] sm:$0xff]  }
  0xa8   :  { %vm129_vm6 = vcmp.eq.s32.totalorder %v1163_v29, %v94_v40  ;;  %vm128_vm7 = vcmp.eq.s32.totalorder %v1163_v29, %v90_v41  ;;  %853 = vmatprep.mubr.msk.bf16.mxu0 %vm245_vm5, %v224_v39  ;;  %v966_v39 = vld [vmem:[#allocation8 + $0x38] sm:$0xff]   ;;  %v967_v40 = vld [vmem:[#allocation8 + $0x30] sm:$0xff]   ;;  %v968_v41 = vld [vmem:[#allocation8 + $0x28] sm:$0xff]  }
  0xa9   :  { %854 = vmatmul.mubr.msk.bf16.vlgmr.msra.gmra.mxu0 %vm245_vm5, %v225_v38  ;;  %vm783_vm8 = vmpackc.low %vm129_vm6, %vm128_vm7  ;;  %vm455_vm7 = vcmp.gt.s32.totalorder %v1158_v28, 1  ;;  %v965_v38 = vld [vmem:[#allocation6] sm:$0xff]  }
  0xaa   :  { %877 = vmatprep.mubr.msk.bf16.mxu1 %vm783_vm8, %v1071_v42  ;;  %v456_v59 = vsel %vm455_vm7, %v1158_v28, 1  ;;  %vm1072_vm8 = vmmov 0  }
  0xab   :  { %v105_v43 = vpop.permute.xlu1 %104  ;;  %v101_v44 = vpop.permute.xlu0 %100  ;;  %v457_v60 = vcvt.s32.f32 %v456_v59 }
  0xac   :  { %vm131_vm9 = vcmp.eq.s32.totalorder %v1163_v29, %v105_v43  ;;  %vm130_vm10 = vcmp.eq.s32.totalorder %v1163_v29, %v101_v44 }
  0xad   :  { %vm785_vm11 = vmpackc.low %vm131_vm9, %vm130_vm10  ;;  %508 = vperm.xlu1 %949, %v457_v60   ;;  %vm445_vm9 = vcmp.lt.s32.totalorder %v443_v13, 16 }
  0xae   :  { %878 = vmatmul.mubr.msk.bf16.vlgmr.msra.gmra.mxu1 %vm785_vm11, %v1071_v42 }
  0xaf   :  { %v188_v45 = vpop.permute.xlu1 %187  ;;  %v184_v46 = vpop.permute.xlu0 %183  ;;  %918 = vmatpush3.bf16.msra.mxu1 %v966_v39 }
  0xb0   :  { %vm205_vm12 = vcmp.eq.s32.totalorder %v1163_v29, %v188_v45  ;;  %vm204_vm13 = vcmp.eq.s32.totalorder %v1163_v29, %v184_v46  ;;  %919 = vmatprep.subr.bf16.mxu1 %v1069_v17 }
  0xb1   :  { %v768_v47 = vsel %vm205_vm12, 1.0, %v1069_v17  ;;  %v767_v48 = vsel %vm204_vm13, 1.0, %v1069_v17  ;;  %vm462_vm13 = vcmask 523264  }
  0xb2   :  { %v226_v49 = vpack.c.bf16 %v768_v47, %v767_v48 }
  0xb3   :  { %v199_v50 = vpop.permute.xlu1 %198  ;;  %v195_v51 = vpop.permute.xlu0 %194  ;;  %920 = vmatpush3.bf16.msra.mxu1 %v967_v40 }
  0xb4   :  { %vm207_vm14 = vcmp.eq.s32.totalorder %v1163_v29, %v199_v50  ;;  %vm206_vm15 = vcmp.eq.s32.totalorder %v1163_v29, %v195_v51  ;;  %857 = vmatprep.mubr.msk.bf16.mxu0 %vm245_vm5, %v226_v49  ;;  %921 = vmatprep.subr.bf16.mxu1 %v1069_v17  ;;  %v969_v50 = vld [vmem:[#allocation8 + $0x20] sm:$0xff]   ;;  %v970_v51 = vld [vmem:[#allocation8 + $0x18] sm:$0xff]  }
  0xb5   :  { %v770_v52 = vsel %vm207_vm14, 1.0, %v1069_v17  ;;  %v769_v53 = vsel %vm206_vm15, 1.0, %v1069_v17 }
  0xb6   :  { %v227_v54 = vpack.c.bf16 %v770_v52, %v769_v53  ;;  %v971_v52 = vld [vmem:[#allocation8 + $0x10] sm:$0xff]   ;;  %v972_v53 = vld [vmem:[#allocation8 + $0x8] sm:$0xff]  }
  0xb7   :  { %v116_v55 = vpop.permute.xlu1 %115  ;;  %v112_v56 = vpop.permute.xlu0 %111  ;;  %922 = vmatpush3.bf16.msra.mxu1 %v968_v41 }
  0xb8   :  { %vm133_vm0 = vcmp.eq.s32.totalorder %v1163_v29, %v116_v55  ;;  %vm132_vm1 = vcmp.eq.s32.totalorder %v1163_v29, %v112_v56  ;;  %858 = vmatmul.mubr.msk.bf16.gmra.mxu0 %vm245_vm5, %v227_v54  ;;  %vm444_vm5 = vcmp.ge.s32.totalorder %v443_v13, 0  ;;  %923 = vmatprep.subr.bf16.mxu1 %v1069_v17  ;;  %v973_v54 = vld [vmem:[#allocation8] sm:$0xff]  }
  0xb9   :  { %vm787_vm2 = vmpackc.low %vm133_vm0, %vm132_vm1  ;;  %893 = vmatprep.mubr.msk.bf16.mxu0 %vm1072_vm8, %v1069_v17  ;;  %v793_v55 = vld [vmem:[%s1238_s7] ss:$0 sm:$0xff]  ;;  %s1038_s7 = scalar_lea.vmem %s746_s14, 64 }
  0xba   :  { %881 = vmatprep.mubr.msk.bf16.mxu1 %vm787_vm2, %v1071_v42  ;;  %vm446_vm10 = vmand %vm444_vm5, %vm445_vm9  ;;  %p1039_p1 = scmp.ne.s32.totalorder %s746_s14, %s1038_s7  ;;  %p1044_p3 = scmp.lt.s32.totalorder %s1038_s7, %s1038_s7 }
  0xbb   :  { %v127_v57 = vpop.permute.xlu1 %126  ;;  %v123_v58 = vpop.permute.xlu0 %122  ;;  %924 = vmatpush3.bf16.msra.mxu1 %v969_v50 }
  0xbc   :  { %vm135_vm3 = vcmp.eq.s32.totalorder %v1163_v29, %v127_v57  ;;  %vm134_vm4 = vcmp.eq.s32.totalorder %v1163_v29, %v123_v58  ;;  %925 = vmatprep.subr.bf16.mxu1 %v1069_v17  ;;  %p1045_p4 = por %p1044_p3, %p1043_p2 }
  0xbd   :  { %vm789_vm6 = vmpackc.low %vm135_vm3, %vm134_vm4 }
  0xbe   :  { %882 = vmatmul.mubr.msk.bf16.gmra.mxu1 %vm789_vm6, %v1071_v42  ;;  %p1046_p5 = pnand %p1045_p4, %p1039_p1 }
  0xbf   :  { %933 = vmatprep.mubr.msk.bf16.mxu1 %vm1072_vm8, %v1069_v17  ;;  %926 = vmatpush3.bf16.msra.mxu1 %v970_v51 }
  0xc0   :  { %927 = vmatprep.subr.bf16.mxu1 %v1069_v17 }
  0xc3   :  { %928 = vmatpush3.bf16.msra.mxu1 %v971_v52 }
  0xc4   :  { %929 = vmatprep.subr.bf16.mxu1 %v1069_v17 }
  0xc7   :  { %930 = vmatpush3.bf16.msra.mxu1 %v972_v53 }
  0xc8   :  { %v449_v21 = vpop.permute.xlu0 %448  ;;  %931 = vmatprep.subr.bf16.mxu1 %v1069_v17 }
  0xc9   :  { %vm450_vm11 = vcmp.lt.s32.totalorder %v443_v13, %v449_v21 }
  0xca   :  { %vm451_vm12 = vmand %vm446_vm10, %vm450_vm11 }
  0xcb   :  { %v791_v28 = vsel %vm451_vm12, 1.0, %v1069_v17  ;;  %932 = vmatpush3.bf16.msra.mxu1 %v973_v54 }
  0xcc   :  { %v454_v30 = vpack.c.bf16 %v791_v28, %v791_v28 }
 0x128   :  { %v509_v42 = vpop.permute.xlu1 %508 }
 0x129   :  { %974 = vrcp.f32 %v509_v42 }
 0x136   :  { %v975_v43 = vpop.eup %974 }
 0x169   :  { %v855_v61 = vpop.f32.mrf.mxu0 }
 0x16b   :  { %v296_v62 = vpop.f32.mrf.mxu0 }
 0x16d   :  { %v856_v0 = vpop.f32.mrf.mxu0 }
 0x16e   :  { %v879_v63 = vpop.f32.mrf.mxu1 }
 0x16f   :  { %v299_v3 = vpop.f32.mrf.mxu0  ;;  %v418_v24 = vadd.f32 %v879_v63, %v855_v61  ;;  %v802_v63 = vld [vmem:[%s1240_s9] ss:$0 sm:$0xff] }
 0x170   :  { %v409_v2 = vpop.f32.mrf.mxu1 }
 0x171   :  { %v410_v27 = vadd.f32 %v409_v2, %v296_v62 }
 0x172   :  { %v880_v4 = vpop.f32.mrf.mxu1 }
 0x173   :  { %v421_v23 = vadd.f32 %v880_v4, %v856_v0 }
 0x174   :  { %v412_v6 = vpop.f32.mrf.mxu1 }
 0x175   :  { %v459_v25 = vpack.c.bf16 %v421_v23, %v418_v24  ;;  %v413_v26 = vadd.f32 %v412_v6, %v299_v3 }
 0x177   :  { %v458_v29 = vpack.c.bf16 %v413_v26, %v410_v27 }
 0x178   :  { %v859_v5 = vpop.f32.mrf.mxu0 }
 0x17a   :  { %v312_v7 = vpop.f32.mrf.mxu0 }
 0x17c   :  { %v860_v10 = vpop.f32.mrf.mxu0 }
 0x17e   :  { %v883_v8 = vpop.f32.mrf.mxu1  ;;  %v315_v16 = vpop.f32.mrf.mxu0 }
 0x17f   :  { %v434_v14 = vadd.f32 %v883_v8, %v859_v5 }
 0x180   :  { %v425_v11 = vpop.f32.mrf.mxu1 }
 0x181   :  { %v426_v22 = vadd.f32 %v425_v11, %v312_v7 }
 0x182   :  { %v884_v12 = vpop.f32.mrf.mxu1 }
 0x183   :  { %v437_v15 = vadd.f32 %v884_v12, %v860_v10 }
 0x184   :  { %v428_v18 = vpop.f32.mrf.mxu1 }
 0x185   :  { %v461_v19 = vpack.c.bf16 %v437_v15, %v434_v14  ;;  %v429_v20 = vadd.f32 %v428_v18, %v315_v16 }
 0x187   :  { %886 = vmatpush3.bf16.msra.mxu0 %v461_v19  ;;  %v460_v1 = vpack.c.bf16 %v429_v20, %v426_v22 }
 0x188   :  { %887 = vmatprep.subr.bf16.mxu0 %v1069_v17 }
 0x18b   :  { %888 = vmatpush3.bf16.msra.mxu0 %v460_v1 }
 0x18c   :  { %889 = vmatprep.subr.bf16.mxu0 %v1069_v17 }
 0x18f   :  { %890 = vmatpush3.bf16.msra.mxu0 %v459_v25 }
 0x190   :  { %891 = vmatprep.subr.bf16.mxu0 %v1069_v17 }
 0x193   :  { %892 = vmatpush3.bf16.msra.mxu0 %v458_v29 }
 0x194   :  { %897 = vmatprep.subr.bf16.mxu0 %v1069_v17 }
 0x196   :  { %894 = vmatmul.mubr.msk.bf16.vlgmr.msra.gmra.mxu0 %vm462_vm13, %v454_v30 }
 0x197   :  { %898 = vmatpush3.bf16.msra.mxu0 %v958_v31  ;;  %913 = vmatprep.mubr.msk.bf16.mxu0 %vm1072_vm8, %v1069_v17 }
 0x198   :  { %899 = vmatprep.subr.bf16.mxu0 %v1069_v17 }
 0x19b   :  { %900 = vmatpush3.bf16.msra.mxu0 %v959_v32 }
 0x19c   :  { %901 = vmatprep.subr.bf16.mxu0 %v1069_v17 }
 0x19f   :  { %902 = vmatpush3.bf16.msra.mxu0 %v960_v33 }
 0x1a0   :  { %903 = vmatprep.subr.bf16.mxu0 %v1069_v17 }
 0x1a3   :  { %904 = vmatpush3.bf16.msra.mxu0 %v961_v34 }
 0x1a4   :  { %905 = vmatprep.subr.bf16.mxu0 %v1069_v17 }
 0x1a7   :  { %906 = vmatpush3.bf16.msra.mxu0 %v962_v35 }
 0x1a8   :  { %907 = vmatprep.subr.bf16.mxu0 %v1069_v17 }
 0x1ab   :  { %908 = vmatpush3.bf16.msra.mxu0 %v963_v36 }
 0x1ac   :  { %909 = vmatprep.subr.bf16.mxu0 %v1069_v17 }
 0x1af   :  { %910 = vmatpush3.bf16.msra.mxu0 %v964_v37 }
 0x1b0   :  { %911 = vmatprep.subr.bf16.mxu0 %v1069_v17 }
 0x1b3   :  { %912 = vmatpush3.bf16.msra.mxu0 %v965_v38 }
 0x256   :  { %v500_v44 = vpop.f32.mrf.mxu0 }
 0x257   :  { %v512_v45 = vmul.f32 %v975_v43, %v500_v44 }
 0x258   :  { %v895_v46 = vpop.f32.mrf.mxu0 }
 0x259   :  { %v513_v47 = vpack.c.bf16 %v512_v45, %v512_v45 }
 0x25a   :  { %v503_v48 = vpop.f32.mrf.mxu0 }
 0x25b   :  { %914 = vmatmul.mubr.bf16.vlgmr.msra.gmra.mxu0 %v513_v47 }
 0x25c   :  { %v896_v49 = vpop.f32.mrf.mxu0 }
 0x31b   :  { %v619_v56 = vpop.f32.mrf.mxu0 }
 0x31c   :  { %v620_v57 = vadd.f32 %v793_v55, %v619_v56 }
 0x31d   :  { %v915_v58 = vpop.f32.mrf.mxu0 }
 0x31e   :  { %976 = vtanh.f32 %v620_v57 }
 0x31f   :  { %v622_v59 = vpop.f32.mrf.mxu0 }
 0x321   :  { %v916_v60 = vpop.f32.mrf.mxu0 }
 0x32b   :  { %v977_v61 = vpop.eup %976 }
 0x32c   :  { %v626_v62 = vpack.c.bf16 %v977_v61, %v977_v61 }
 0x32e   :  { %934 = vmatmul.mubr.bf16.vlgmr.msra.gmra.mxu1 %v626_v62 }
 0x3ee   :  { %v732_v17 = vpop.f32.mrf.mxu1 }
 0x3ef   :  { %v733_v0 = vadd.f32 %v802_v63, %v732_v17 }
 0x3f0   :  { %v935_v2 = vpop.f32.mrf.mxu1 }
 0x3f1   :  { %738 = vst [vmem:[#allocation9] sm:$0xf] %v733_v0 }
 0x3f2   :  { %v735_v3 = vpop.f32.mrf.mxu1 }
 0x3f3   :  { %1049 = shalt.err (!%p1046_p5)
}
 0x3f4   :  { %748 = dma.vmem_to_hbm [thread:$0]  %s746_s14, 64, %s1241_s10, [#allocation5]   ;;  %v936_v4 = vpop.f32.mrf.mxu1 }
 0x3f5   :  { %1062 = dma.done.wait [#allocation5], 64  }
 0x3f6   :  { %1063 = vsyncadd [#allocation5], 4294967232 }
 0x3f7   :  { %752 = vsyncpa [#allocation4], 1 }
 0x3f8   :  { %753 = vsyncpa [#allocation7], 1 }
 0x3f9   :  { %754 = vsyncpa [#allocation5], 1 }

</bundles_post_ra>
